<compile_context>
chip_gen: v5e
topology: v5e:2x2
jax: 0.10.0
libtpu: 0.0.40
codegen_flags: <defaults>
</compile_context>

<pallas_src>
import functools

import jax
import jax.numpy as jnp
from jax import lax
from jax.experimental import pallas as pl
from jax.experimental.pallas import tpu as pltpu


def _sq_embedding_kernel(nvalid_ref, logvar_ref, x_ref, embt_ref, emb_ref,
                         embsq_ref, g_ref,
                         q_ref, idx_ref, hist_ref, loss_ref, *, tau):
    x = x_ref[...]                              # (TN, D) f32
    emb_t = embt_ref[...]                       # (D, M) f32  codebook^T (resident)
    emb = emb_ref[...]                          # (M, D) f32  codebook   (resident)
    e_sq = embsq_ref[...]                       # (1, M)  f32  sum_d emb^2 (resident)
    g = g_ref[...]                              # (TN, M) f32 gumbel noise
    log_var_q = logvar_ref[0]                   # scalar (gaussian_1)
    precision = jnp.exp(-log_var_q)

    TN, D = x.shape
    M = emb.shape[0]

    # Reduced distances: true distance = d_red + 0.5*precision*||x||^2 (per-row
    # constant, cancels everywhere it is used below).  Cross term in canonical
    # (TN,D)x(D,M) MXU layout — no per-tile transpose, no ones-matmul.
    cross = jnp.dot(x, emb_t, preferred_element_type=jnp.float32)   # (TN, M)
    d_red = (0.5 * precision) * (e_sq - 2.0 * cross)                # (TN, M)

    # argmin over codes (first minimal index, matching torch.argmin)
    lane_iota = lax.broadcasted_iota(jnp.int32, (TN, M), 1)
    min_d = jnp.min(d_red, axis=-1, keepdims=True)                  # (TN, 1)
    idx = jnp.min(jnp.where(d_red == min_d, lane_iota, M),
                  axis=-1, keepdims=True)                           # (TN, 1)
    idx_ref[...] = idx

    # logits - max(logits): max of logits == -min of distances (reuse min_d,
    # saves a second lane-axis XLU reduction).
    logits_shift = min_d - d_red                                    # <= 0

    # gumbel-softmax (soft, hard=False); noise precomputed in the wrapper
    g_logits = (logits_shift + g) * (1.0 / tau)
    g_max = jnp.max(g_logits, axis=-1, keepdims=True)
    g_exp = jnp.exp(g_logits - g_max)
    g_sum = jnp.sum(g_exp, axis=-1, keepdims=True)
    encodings = g_exp * pl.reciprocal(g_sum, approx=True)           # (TN, M)

    # quantized = encodings @ embedding
    quantized = jnp.dot(encodings, emb, preferred_element_type=jnp.float32)
    q_ref[...] = quantized.astype(q_ref.dtype)

    # softmax / log_softmax of logits for the entropy term
    l_exp = jnp.exp(logits_shift)
    l_sum = jnp.sum(l_exp, axis=-1, keepdims=True)
    probs = l_exp * pl.reciprocal(l_sum, approx=True)
    log_probs = logits_shift - jnp.log(l_sum)

    # mask out rows belonging to the padded tail tile
    row = pl.program_id(0) * TN + lax.broadcasted_iota(jnp.int32, (TN, 1), 0)
    valid = (row < nvalid_ref[0]).astype(jnp.float32)               # (TN, 1)

    diff = x - quantized
    recon = (0.5 * precision) * jnp.sum(valid * (diff * diff))
    entropy = jnp.sum(valid * (probs * log_probs))
    # per-tile partial loss scalar (wrapper sums over tiles)
    loss_ref[...] = jnp.full((1, 8, 128), recon + entropy, dtype=jnp.float32)

    # per-tile code histogram from the hard argmin indices (wrapper reduces)
    one_hot = jnp.where(lane_iota == idx, valid, 0.0)               # (TN, M)
    hist = jnp.sum(one_hot, axis=0, keepdims=True)                  # (1, M)
    hist_ref[...] = jnp.broadcast_to(hist.reshape(1, 1, M), (1, 8, M))


def _gumbel_noise(key, shape):
    eps = jnp.finfo(jnp.float32).eps
    u = jax.random.uniform(key, shape, dtype=jnp.float32)
    return -jnp.log(-jnp.log(jnp.clip(u, eps, 1.0 - eps)))


def sq_embedding_forward(x, embedding, log_var_q_scalar, key,
                         temperature=1.0, block_n=512):
    """Pallas-backed SQEmbedding.forward (param_var_q='gaussian_1').

    x: (N, D) rows (the module's x.view(-1, embedding_dim)).
    Returns (quantized (N, D), indices (N,), loss scalar, perplexity scalar).
    """
    x = x.astype(jnp.float32)
    embedding = embedding.astype(jnp.float32)
    N, D = x.shape
    M = embedding.shape[0]

    # N-tile: multiple of 8 sublanes; default 512 fits the v7x 64 MiB VMEM
    # budget with double-buffered x/noise tiles, v5e/v6e can pass larger block_n.
    TN = min(int(block_n), ((N + 7) // 8) * 8)
    TN = max(8, (TN // 8) * 8)
    num_tiles = (N + TN - 1) // TN
    n_pad = num_tiles * TN

    # Codebook in both layouts + precomputed ||e||^2 row (replaces the
    # in-kernel ones-matmul and the per-tile x @ emb.T re-layout).
    emb_t = embedding.T                                          # (D, M)
    emb_sq = jnp.sum(embedding * embedding, axis=1)[None, :]     # (1, M)

    # Gumbel noise precomputed once (torch.rand_like equivalent; RNG streams
    # necessarily differ).  The two logs fuse with the RNG in XLA, keeping the
    # kernel's single EUP for the softmax exps.
    # TODO(synk): on bandwidth-bound v5e/v6e, generate the noise in-kernel with
    # pltpu.prng_seed/prng_random_bits to save the (N, M) HBM read.
    gumbels = _gumbel_noise(key, (N, M))

    if n_pad != N:
        x_pad = jnp.pad(x, ((0, n_pad - N), (0, 0)))
        g_pad = jnp.pad(gumbels, ((0, n_pad - N), (0, 0)))
    else:
        x_pad, g_pad = x, gumbels

    n_valid = jnp.asarray([N], dtype=jnp.int32)
    log_var = log_var_q_scalar.reshape((1,)).astype(jnp.float32)

    kernel = functools.partial(_sq_embedding_kernel, tau=float(temperature))

    q_pad, idx_pad, hist_part, loss_part = pl.pallas_call(
        kernel,
        grid=(num_tiles,),
        in_specs=[
            pl.BlockSpec(memory_space=pltpu.MemorySpace.SMEM),     # n_valid
            pl.BlockSpec(memory_space=pltpu.MemorySpace.SMEM),     # log_var_q
            pl.BlockSpec((TN, D), lambda i: (i, 0)),               # x tile
            pl.BlockSpec((D, M), lambda i: (0, 0)),                # embedding.T
            pl.BlockSpec((M, D), lambda i: (0, 0)),                # embedding
            pl.BlockSpec((1, M), lambda i: (0, 0)),                # ||e||^2
            pl.BlockSpec((TN, M), lambda i: (i, 0)),               # gumbel noise
        ],
        out_specs=(
            pl.BlockSpec((TN, D), lambda i: (i, 0)),               # quantized
            pl.BlockSpec((TN, 1), lambda i: (i, 0)),               # indices
            pl.BlockSpec((1, 8, M), lambda i: (i, 0, 0)),          # hist partial
            pl.BlockSpec((1, 8, 128), lambda i: (i, 0, 0)),        # loss partial
        ),
        out_shape=(
            jax.ShapeDtypeStruct((n_pad, D), jnp.float32),
            jax.ShapeDtypeStruct((n_pad, 1), jnp.int32),
            jax.ShapeDtypeStruct((num_tiles, 8, M), jnp.float32),
            jax.ShapeDtypeStruct((num_tiles, 8, 128), jnp.float32),
        ),
        compiler_params=pltpu.CompilerParams(
            dimension_semantics=("parallel",),
            vmem_limit_bytes=40 * 1024 * 1024,
        ),
    )(n_valid, log_var, x_pad, emb_t, embedding, emb_sq, g_pad)

    quantized = q_pad[:N]
    indices = idx_pad[:N, 0]
    loss = jnp.sum(loss_part[:, 0, 0])                      # sum of per-tile partials
    counts = jnp.sum(hist_part[:, 0, :], axis=0)            # (M,) global code counts
    avg_probs = counts / N
    perplexity = jnp.exp(-jnp.sum(avg_probs * jnp.log(avg_probs + 1e-10)))
    return quantized, indices, loss, perplexity


def _reference_forward(x, embedding, log_var_q_scalar, gumbels, temperature=1.0):
    """Pure-JAX replica of SQEmbedding.forward (gaussian_1) for verification."""
    precision = jnp.exp(-log_var_q_scalar[0])
    # distances[n, m] = 0.5 * precision * sum_d (emb[m, d] - x[n, d])^2
    d = 0.5 * precision * jnp.sum(
        (embedding.T[None, :, :] - x[:, :, None]) ** 2, axis=1)       # (N, M)
    indices = jnp.argmin(d, axis=-1)
    logits = -d
    encodings = jax.nn.softmax((logits + gumbels) / temperature, axis=-1)
    quantized = encodings @ embedding
    probs = jax.nn.softmax(logits, axis=-1)
    log_probs = jax.nn.log_softmax(logits, axis=-1)
    loss = 0.5 * precision * jnp.sum((x - quantized) ** 2) + jnp.sum(probs * log_probs)
    one_hot = jax.nn.one_hot(indices, embedding.shape[0], dtype=jnp.float32)
    avg = jnp.mean(one_hot, axis=0)
    ppl = jnp.exp(-jnp.sum(avg * jnp.log(avg + 1e-10)))
    return quantized, indices, loss, ppl, d


if __name__ == "__main__":
    # module config (small): n_embeddings M=16, embedding_dim D=32
    # input: batch=2, seq=9 -> N=18 flattened rows (forward's x.view(-1, D))
    M, D = 16, 32
    B, T = 2, 9
    N = B * T

    key = jax.random.PRNGKey(0)
    k_emb, k_x, k_noise = jax.random.split(key, 3)

    # deterministic parameter init matching __init__ semantics:
    #   embedding ~ Normal(0, 1), log_var_q_scalar = log(10.0)
    embedding = jax.random.normal(k_emb, (M, D), dtype=jnp.float32)
    log_var_q_scalar = jnp.log(jnp.full((1,), 10.0, dtype=jnp.float32))

    x = jax.random.normal(k_x, (B, T, D), dtype=jnp.float32).reshape(-1, D)

    # small tile so the demo exercises a multi-step grid plus a padded tail tile
    quantized, indices, loss, perplexity = sq_embedding_forward(
        x, embedding, log_var_q_scalar, k_noise, temperature=1.0, block_n=8)
    jax.block_until_ready((quantized, indices, loss, perplexity))

    assert quantized.shape == (N, D)
    assert indices.shape == (N,)
    assert loss.shape == () and perplexity.shape == ()

    # verify against a pure-JAX reference using the exact same gumbel noise
    gumbels = _gumbel_noise(k_noise, (N, M))
    q_ref, idx_ref, loss_ref, ppl_ref, d_ref = _reference_forward(
        x, embedding, log_var_q_scalar, gumbels, temperature=1.0)

    assert bool(jnp.all(jnp.isfinite(quantized)))
    assert bool(jnp.allclose(quantized, q_ref, rtol=2e-2, atol=2e-2))
    assert bool(jnp.allclose(loss, loss_ref, rtol=2e-2, atol=2e-2))
    # each selected code must attain the per-row minimum distance (tie-robust)
    row_ids = jnp.arange(N)
    assert bool(jnp.all(d_ref[row_ids, indices]
                        <= jnp.min(d_ref, axis=-1) + 1e-3))
    # perplexity path: consistent with a histogram built from the kernel's indices
    counts_from_idx = jnp.sum(
        jax.nn.one_hot(indices, M, dtype=jnp.float32), axis=0) / N
    ppl_from_idx = jnp.exp(-jnp.sum(counts_from_idx *
                                    jnp.log(counts_from_idx + 1e-10)))
    assert bool(jnp.allclose(perplexity, ppl_from_idx, rtol=1e-4, atol=1e-4))

    print("KERNEL_OK")
</pallas_src>

<mosaic_0001>
module attributes {stable_mosaic.version = 11 : i64} {
  func.func @_sq_embedding_kernel(%arg0: i32, %arg1: memref<1xi32, #tpu.memory_space<smem>>, %arg2: memref<1xf32, #tpu.memory_space<smem>>, %arg3: memref<8x32xf32, #tpu.memory_space<vmem>>, %arg4: memref<32x16xf32, #tpu.memory_space<vmem>>, %arg5: memref<16x32xf32, #tpu.memory_space<vmem>>, %arg6: memref<1x16xf32, #tpu.memory_space<vmem>>, %arg7: memref<8x16xf32, #tpu.memory_space<vmem>>, %arg8: memref<8x32xf32, #tpu.memory_space<vmem>>, %arg9: memref<8x1xi32, #tpu.memory_space<vmem>>, %arg10: memref<1x8x16xf32, #tpu.memory_space<vmem>>, %arg11: memref<1x8x128xf32, #tpu.memory_space<vmem>>) attributes {dimension_semantics = [#tpu.dimension_semantics<parallel>], iteration_bounds = array<i64: 3>, scalar_prefetch = 0 : i64, scratch_operands = 0 : i64, tpu.core_type = #tpu.core_type<tc>, window_params = [{transform_indices = @transform_0, window_bounds = array<i64: 1>}, {transform_indices = @transform_1, window_bounds = array<i64: 1>}, {transform_indices = @transform_2, window_bounds = array<i64: 8, 32>}, {pipeline_mode = #tpu.pipeline_mode<synchronous>, transform_indices = @transform_3, window_bounds = array<i64: 32, 16>}, {pipeline_mode = #tpu.pipeline_mode<synchronous>, transform_indices = @transform_4, window_bounds = array<i64: 16, 32>}, {pipeline_mode = #tpu.pipeline_mode<synchronous>, transform_indices = @transform_5, window_bounds = array<i64: 1, 16>}, {transform_indices = @transform_6, window_bounds = array<i64: 8, 16>}, {transform_indices = @transform_7, window_bounds = array<i64: 8, 32>}, {transform_indices = @transform_8, window_bounds = array<i64: 8, 1>}, {transform_indices = @transform_9, window_bounds = array<i64: 1, 8, 16>}, {transform_indices = @transform_10, window_bounds = array<i64: 1, 8, 128>}]} {
    %c0 = arith.constant 0 : index
    %c0_0 = arith.constant 0 : index
    %0 = vector.load %arg3[%c0, %c0_0] : memref<8x32xf32, #tpu.memory_space<vmem>>, vector<8x32xf32>
    %c0_1 = arith.constant 0 : index
    %c0_2 = arith.constant 0 : index
    %1 = vector.load %arg4[%c0_1, %c0_2] : memref<32x16xf32, #tpu.memory_space<vmem>>, vector<32x16xf32>
    %c0_3 = arith.constant 0 : index
    %c0_4 = arith.constant 0 : index
    %2 = vector.load %arg5[%c0_3, %c0_4] : memref<16x32xf32, #tpu.memory_space<vmem>>, vector<16x32xf32>
    %c0_5 = arith.constant 0 : index
    %c0_6 = arith.constant 0 : index
    %3 = vector.load %arg6[%c0_5, %c0_6] : memref<1x16xf32, #tpu.memory_space<vmem>>, vector<1x16xf32>
    %c0_7 = arith.constant 0 : index
    %c0_8 = arith.constant 0 : index
    %4 = vector.load %arg7[%c0_7, %c0_8] : memref<8x16xf32, #tpu.memory_space<vmem>>, vector<8x16xf32>
    %c0_9 = arith.constant 0 : index
    %5 = memref.load %arg2[%c0_9] : memref<1xf32, #tpu.memory_space<smem>>
    %cst = arith.constant 0.000000e+00 : f32
    %6 = arith.subf %cst, %5 : f32
    %7 = math.exp %6 : f32
    %cst_10 = arith.constant dense<0.000000e+00> : vector<8x16xf32>
    %8 = tpu.matmul %0, %1, %cst_10 {dimension_numbers = #tpu.dot_dimension_numbers<[1], [0], [0], [1], [0, 0, 1, 1], [], []>} : vector<8x32xf32>, vector<32x16xf32>, vector<8x16xf32> -> vector<8x16xf32>
    %cst_11 = arith.constant 5.000000e-01 : f32
    %9 = arith.mulf %cst_11, %7 : f32
    %cst_12 = arith.constant 2.000000e+00 : f32
    %10 = vector.broadcast %cst_12 : f32 to vector<8x16xf32>
    %11 = arith.mulf %10, %8 : vector<8x16xf32>
    %12 = vector.broadcast %3 : vector<1x16xf32> to vector<8x16xf32>
    %13 = arith.subf %12, %11 : vector<8x16xf32>
    %14 = vector.broadcast %9 : f32 to vector<8x16xf32>
    %15 = arith.mulf %14, %13 : vector<8x16xf32>
    %16 = tpu.iota {dimensions = array<i32: 1>} : vector<8x16xi32>
    %cst_13 = arith.constant dense<0x7F800000> : vector<8xf32>
    %17 = vector.multi_reduction <minimumf>, %15, %cst_13 [1] : vector<8x16xf32> to vector<8xf32>
    %18 = vector.shape_cast %17 : vector<8xf32> to vector<8x1xf32>
    %19 = vector.broadcast %18 : vector<8x1xf32> to vector<8x16xf32>
    %20 = arith.cmpf oeq, %15, %19 : vector<8x16xf32>
    %c16_i32 = arith.constant 16 : i32
    %21 = vector.broadcast %c16_i32 : i32 to vector<8x16xi32>
    %22 = arith.select %20, %16, %21 : vector<8x16xi1>, vector<8x16xi32>
    %cst_14 = arith.constant dense<2147483647> : vector<8xi32>
    %23 = vector.multi_reduction <minsi>, %22, %cst_14 [1] : vector<8x16xi32> to vector<8xi32>
    %24 = vector.shape_cast %23 : vector<8xi32> to vector<8x1xi32>
    %c0_15 = arith.constant 0 : index
    %c0_16 = arith.constant 0 : index
    %25 = vector.load %arg9[%c0_15, %c0_16] : memref<8x1xi32, #tpu.memory_space<vmem>>, vector<8x1xi32>
    tpu.vector_store %arg9[%c0_15, %c0_16], %24 {strides = array<i32>} : memref<8x1xi32, #tpu.memory_space<vmem>>, vector<8x1xi32>,
    %26 = vector.broadcast %18 : vector<8x1xf32> to vector<8x16xf32>
    %27 = arith.subf %26, %15 : vector<8x16xf32>
    %28 = arith.addf %27, %4 : vector<8x16xf32>
    %cst_17 = arith.constant 1.000000e+00 : f32
    %29 = vector.broadcast %cst_17 : f32 to vector<8x16xf32>
    %30 = arith.mulf %28, %29 : vector<8x16xf32>
    %cst_18 = arith.constant dense<0xFF800000> : vector<8xf32>
    %31 = vector.multi_reduction <maximumf>, %30, %cst_18 [1] : vector<8x16xf32> to vector<8xf32>
    %32 = vector.shape_cast %31 : vector<8xf32> to vector<8x1xf32>
    %33 = vector.broadcast %32 : vector<8x1xf32> to vector<8x16xf32>
    %34 = arith.subf %30, %33 : vector<8x16xf32>
    %35 = math.exp %34 : vector<8x16xf32>
    %cst_19 = arith.constant dense<0.000000e+00> : vector<8xf32>
    %36 = vector.multi_reduction <add>, %35, %cst_19 [1] : vector<8x16xf32> to vector<8xf32>
    %37 = vector.shape_cast %36 : vector<8xf32> to vector<8x1xf32>
    %38 = tpu.reciprocal %37 {approx = true} : vector<8x1xf32> -> vector<8x1xf32>
    %39 = vector.broadcast %38 : vector<8x1xf32> to vector<8x16xf32>
    %40 = arith.mulf %35, %39 : vector<8x16xf32>
    %cst_20 = arith.constant dense<0.000000e+00> : vector<8x32xf32>
    %41 = tpu.matmul %40, %2, %cst_20 {dimension_numbers = #tpu.dot_dimension_numbers<[1], [0], [0], [1], [0, 0, 1, 1], [], []>} : vector<8x16xf32>, vector<16x32xf32>, vector<8x32xf32> -> vector<8x32xf32>
    %c0_21 = arith.constant 0 : index
    %c0_22 = arith.constant 0 : index
    %42 = vector.load %arg8[%c0_21, %c0_22] : memref<8x32xf32, #tpu.memory_space<vmem>>, vector<8x32xf32>
    tpu.vector_store %arg8[%c0_21, %c0_22], %41 {strides = array<i32>} : memref<8x32xf32, #tpu.memory_space<vmem>>, vector<8x32xf32>,
    %43 = math.exp %27 : vector<8x16xf32>
    %cst_23 = arith.constant dense<0.000000e+00> : vector<8xf32>
    %44 = vector.multi_reduction <add>, %43, %cst_23 [1] : vector<8x16xf32> to vector<8xf32>
    %45 = vector.shape_cast %44 : vector<8xf32> to vector<8x1xf32>
    %46 = tpu.reciprocal %45 {approx = true} : vector<8x1xf32> -> vector<8x1xf32>
    %47 = vector.broadcast %46 : vector<8x1xf32> to vector<8x16xf32>
    %48 = arith.mulf %43, %47 : vector<8x16xf32>
    %49 = math.log %45 : vector<8x1xf32>
    %50 = vector.broadcast %49 : vector<8x1xf32> to vector<8x16xf32>
    %51 = arith.subf %27, %50 : vector<8x16xf32>
    %c8_i32 = arith.constant 8 : i32
    %52 = arith.muli %arg0, %c8_i32 : i32
    %53 = tpu.iota {dimensions = array<i32: 0>} : vector<8x1xi32>
    %54 = vector.broadcast %52 : i32 to vector<8x1xi32>
    %55 = arith.addi %54, %53 : vector<8x1xi32>
    %c0_24 = arith.constant 0 : index
    %56 = memref.load %arg1[%c0_24] : memref<1xi32, #tpu.memory_space<smem>>
    %57 = vector.broadcast %56 : i32 to vector<8x1xi32>
    %58 = arith.cmpi slt, %55, %57 : vector<8x1xi32>
    %59 = arith.extui %58 : vector<8x1xi1> to vector<8x1xi32>
    %60 = arith.sitofp %59 : vector<8x1xi32> to vector<8x1xf32>
    %61 = arith.subf %0, %41 : vector<8x32xf32>
    %cst_25 = arith.constant 5.000000e-01 : f32
    %62 = arith.mulf %cst_25, %7 : f32
    %63 = arith.mulf %61, %61 : vector<8x32xf32>
    %64 = vector.broadcast %60 : vector<8x1xf32> to vector<8x32xf32>
    %65 = arith.mulf %64, %63 : vector<8x32xf32>
    %66 = vector.shape_cast %65 : vector<8x32xf32> to vector<1x8x32xf32>
    %cst_26 = arith.constant dense<0.000000e+00> : vector<1xf32>
    %67 = vector.multi_reduction <add>, %66, %cst_26 [1, 2] : vector<1x8x32xf32> to vector<1xf32>
    %68 = vector.shape_cast %67 : vector<1xf32> to vector<1x1x1xf32>
    %69 = vector.extract %68[0, 0, 0] : f32 from vector<1x1x1xf32>
    %70 = arith.mulf %62, %69 : f32
    %71 = arith.mulf %48, %51 : vector<8x16xf32>
    %72 = vector.broadcast %60 : vector<8x1xf32> to vector<8x16xf32>
    %73 = arith.mulf %72, %71 : vector<8x16xf32>
    %74 = vector.shape_cast %73 : vector<8x16xf32> to vector<1x8x16xf32>
    %cst_27 = arith.constant dense<0.000000e+00> : vector<1xf32>
    %75 = vector.multi_reduction <add>, %74, %cst_27 [1, 2] : vector<1x8x16xf32> to vector<1xf32>
    %76 = vector.shape_cast %75 : vector<1xf32> to vector<1x1x1xf32>
    %77 = vector.extract %76[0, 0, 0] : f32 from vector<1x1x1xf32>
    %78 = arith.addf %70, %77 : f32
    %79 = vector.broadcast %78 : f32 to vector<1x8x128xf32>
    %c0_28 = arith.constant 0 : index
    %c0_29 = arith.constant 0 : index
    %c0_30 = arith.constant 0 : index
    %80 = vector.load %arg11[%c0_28, %c0_29, %c0_30] : memref<1x8x128xf32, #tpu.memory_space<vmem>>, vector<1x8x128xf32>
    tpu.vector_store %arg11[%c0_28, %c0_29, %c0_30], %79 {strides = array<i32>} : memref<1x8x128xf32, #tpu.memory_space<vmem>>, vector<1x8x128xf32>,
    %81 = vector.broadcast %24 : vector<8x1xi32> to vector<8x16xi32>
    %82 = arith.cmpi eq, %16, %81 : vector<8x16xi32>
    %cst_31 = arith.constant 0.000000e+00 : f32
    %83 = vector.shape_cast %60 : vector<8x1xf32> to vector<8x1xf32>
    %84 = vector.broadcast %83 : vector<8x1xf32> to vector<8x16xf32>
    %85 = vector.broadcast %cst_31 : f32 to vector<8x16xf32>
    %86 = arith.select %82, %84, %85 : vector<8x16xi1>, vector<8x16xf32>
    %cst_32 = arith.constant dense<0.000000e+00> : vector<16xf32>
    %87 = vector.multi_reduction <add>, %86, %cst_32 [0] : vector<8x16xf32> to vector<16xf32>
    %88 = vector.shape_cast %87 : vector<16xf32> to vector<1x16xf32>
    %89 = vector.shape_cast %88 : vector<1x16xf32> to vector<1x1x16xf32>
    %90 = vector.shape_cast %89 : vector<1x1x16xf32> to vector<1x1x16xf32>
    %91 = vector.broadcast %90 : vector<1x1x16xf32> to vector<1x8x16xf32>
    %c0_33 = arith.constant 0 : index
    %c0_34 = arith.constant 0 : index
    %c0_35 = arith.constant 0 : index
    %92 = vector.load %arg10[%c0_33, %c0_34, %c0_35] : memref<1x8x16xf32, #tpu.memory_space<vmem>>, vector<1x8x16xf32>
    tpu.vector_store %arg10[%c0_33, %c0_34, %c0_35], %91 {strides = array<i32>} : memref<1x8x16xf32, #tpu.memory_space<vmem>>, vector<1x8x16xf32>,
    return
  }
  func.func @transform_0(%arg0: i32) -> i32 {
    %c0_i32 = arith.constant 0 : i32
    %c0_i32_0 = arith.constant 0 : i32
    return %c0_i32 : i32
  }
  func.func @transform_1(%arg0: i32) -> i32 {
    %c0_i32 = arith.constant 0 : i32
    %c0_i32_0 = arith.constant 0 : i32
    return %c0_i32 : i32
  }
  func.func @transform_2(%arg0: i32) -> (i32, i32) {
    %c0_i32 = arith.constant 0 : i32
    %c0_i32_0 = arith.constant 0 : i32
    return %arg0, %c0_i32 : i32, i32
  }
  func.func @transform_3(%arg0: i32) -> (i32, i32) {
    %c0_i32 = arith.constant 0 : i32
    %c0_i32_0 = arith.constant 0 : i32
    %c0_i32_1 = arith.constant 0 : i32
    return %c0_i32, %c0_i32_0 : i32, i32
  }
  func.func @transform_4(%arg0: i32) -> (i32, i32) {
    %c0_i32 = arith.constant 0 : i32
    %c0_i32_0 = arith.constant 0 : i32
    %c0_i32_1 = arith.constant 0 : i32
    return %c0_i32, %c0_i32_0 : i32, i32
  }
  func.func @transform_5(%arg0: i32) -> (i32, i32) {
    %c0_i32 = arith.constant 0 : i32
    %c0_i32_0 = arith.constant 0 : i32
    %c0_i32_1 = arith.constant 0 : i32
    return %c0_i32, %c0_i32_0 : i32, i32
  }
  func.func @transform_6(%arg0: i32) -> (i32, i32) {
    %c0_i32 = arith.constant 0 : i32
    %c0_i32_0 = arith.constant 0 : i32
    return %arg0, %c0_i32 : i32, i32
  }
  func.func @transform_7(%arg0: i32) -> (i32, i32) {
    %c0_i32 = arith.constant 0 : i32
    %c0_i32_0 = arith.constant 0 : i32
    return %arg0, %c0_i32 : i32, i32
  }
  func.func @transform_8(%arg0: i32) -> (i32, i32) {
    %c0_i32 = arith.constant 0 : i32
    %c0_i32_0 = arith.constant 0 : i32
    return %arg0, %c0_i32 : i32, i32
  }
  func.func @transform_9(%arg0: i32) -> (i32, i32, i32) {
    %c0_i32 = arith.constant 0 : i32
    %c0_i32_0 = arith.constant 0 : i32
    %c0_i32_1 = arith.constant 0 : i32
    return %arg0, %c0_i32, %c0_i32_0 : i32, i32, i32
  }
  func.func @transform_10(%arg0: i32) -> (i32, i32, i32) {
    %c0_i32 = arith.constant 0 : i32
    %c0_i32_0 = arith.constant 0 : i32
    %c0_i32_1 = arith.constant 0 : i32
    return %arg0, %c0_i32, %c0_i32_0 : i32, i32, i32
  }
}

</mosaic_0001>

<bundles_post_ra>
// kernel: tpu_custom_call.1
= control target key start
LH: loop header
LB: loop body
LE: loop exit
PB: predicated region body
PF: predicated region fallthrough
CT: control target
= control target key end

     0   :  { %s1265_s0 = inlined_call_operand.<no memory space> [shape: s32[1], index: 0, kind: input, shape index: {}]   ;;  %s1266_s1 = inlined_call_operand.<no memory space> [shape: f32[1], index: 1, kind: input, shape index: {}]   ;;  %s1267_s2 = inlined_call_operand.vmem [shape: f32[24,32], index: 2, kind: input, shape index: {}]   ;;  %s1268_s3 = inlined_call_operand.vmem [shape: f32[32,16], index: 3, kind: input, shape index: {}]   ;;  %s1269_s4 = inlined_call_operand.vmem [shape: f32[16,32], index: 4, kind: input, shape index: {}]   ;;  %s1270_s5 = inlined_call_operand.vmem [shape: f32[1,16], index: 5, kind: input, shape index: {}]   ;;  %s1271_s6 = inlined_call_operand.vmem [shape: f32[24,16], index: 6, kind: input, shape index: {}]   ;;  %s1272_s7 = inlined_call_operand.hbm [shape: f32[24,32], index: 7, kind: output, shape index: {0}]   ;;  %s1273_s8 = inlined_call_operand.vmem [shape: s32[24,1], index: 8, kind: output, shape index: {1}]   ;;  %s1274_s9 = inlined_call_operand.hbm [shape: f32[3,8,16], index: 9, kind: output, shape index: {2}]   ;;  %s1275_s10 = inlined_call_operand.hbm [shape: f32[3,8,128], index: 10, kind: output, shape index: {3}]  }
   0x1   :  { %1280 = sst [smem:[#allocation11_spill]] %s1267_s2 }
   0x2   :  { %1281 = sst [smem:[#allocation12_spill]] %s1268_s3 }
   0x3   :  { %1282 = sst [smem:[#allocation13_spill]] %s1269_s4 }
   0x4   :  { %1283 = sst [smem:[#allocation14_spill]] %s1270_s5 }
   0x5   :  { %16 = sst [smem:[#allocation2]] %s1265_s0 }
   0x6   :  { %17 = sst [smem:[#allocation3]] %s1266_s1 }
   0x7   :  { %18 = vsyncpa [#allocation5], 0 }
   0x8   :  { %20 = vsyncpa [#allocation5 + $0x1], 0 }
   0x9   :  { %21 = vsyncpa [#allocation7], 0 }
   0xa   :  { %23 = vsyncpa [#allocation7 + $0x1], 0  ;;  %s1066_s17 = smov 0   ;;  %s1068_s18 = smov 0  }
   0xb   :  { %s1070_s19 = smov 0   ;;  %s1072_s20 = smov 0  }
   0xc LB: > { %s1087_s0 = sadd.s32 4294967295, %s1002_s20   ;;  %s1276_s1 = sadd.s32 4294967294, %s1002_s20   ;;  %s1002_s20 = sphi %s1072_s20, %s1297_s20   ;;  %s998_s19 = sphi %s1070_s19, %s1296_s19   ;;  %s994_s18 = sphi %s1068_s18, %s1295_s18   ;;  %s990_s17 = sphi %s1066_s17, %s1294_s17  }
   0xd   : > { %s1091_s21 = sadd.s32 1, %s1002_s20   ;;  %s193_s22 = sadd.s32 1, %s998_s19 }
   0xe   : > { %s190_s23 = ssub.s32 %s1002_s20, %s1091_s21  ;;  %p203_p0 = scmp.ne.s32.totalorder %s998_s19, %s994_s18 }
   0xf   : > { %p191_p1 = scmp.eq.s32.totalorder %s190_s23, 0  ;;  %p204_p2 = scmp.eq.s32.totalorder %s1087_s0, 2 }
  0x10   : > { %p209_p3 = scmp.ne.s32.totalorder %s994_s18, %s990_s17  ;;  %p210_p4 = scmp.eq.s32.totalorder %s1276_s1, 2 }
  0x11   : > { %s1104_s24 = scalar_select %p191_p1, %s998_s19, %s193_s22  }
  0x12   : > { %p1106_p5 = por %p204_p2, %p203_p0  ;;  %p1110_p6 = por %p210_p4, %p209_p3 }
  0x13   : > { %p792_p7 = scmp.ge.s32.totalorder %s1002_s20, 1  ;;  %p335_p8 = scmp.lt.s32.totalorder %s1002_s20, 4 }
  0x15   : > { %p336_p9 = pnand %p792_p7, %p335_p8 }
  0x16   : > { %s1286_s3 = sld [smem:[#allocation12_spill]] (!%p336_p9)  ;;  %p390_p10 = scmp.lt.s32.totalorder (!%p336_p9), %s1087_s0, 2 }
  0x17   : > { %339 = sbr.rel (%p336_p9) target bundleno = 868 (0x364), region = 48  ;;  %s411_s11 = sld [smem:[#allocation3]] (!%p336_p9) }
  0x18   : > { %s1287_s2 = sld [smem:[#allocation11_spill]] (!%p336_p9)  ;;  %s1278_s23 = sand.u32 (!%p336_p9), 1, %s994_s18  }
  0x19   : > { %s1288_s5 = sld [smem:[#allocation14_spill]] (!%p336_p9)  ;;  %s1180_s27 = sshll.u32 (!%p336_p9), %s1278_s23, 3 }
  0x1a   : > { %s1289_s4 = sld [smem:[#allocation13_spill]] (!%p336_p9)  ;;  %s579_s15 = sand.u32 (!%p336_p9), 1, %s1087_s0  }
  0x1b   : > { %s526_s13 = sld [smem:[#allocation2]] (!%p336_p9) }
  0x1c   : > { %v406_v0 = vld [vmem:[%s1286_s3 + $0x18] sm:$0xff]  ;;  %v405_v1 = vld [vmem:[%s1286_s3 + $0x10] sm:$0xff]  ;;  %v404_v2 = vld [vmem:[%s1286_s3 + $0x8] sm:$0xff]  ;;  %s391_s14 = scalar_select %p390_p10, %s1087_s0, 2  ;;  %vm417_vm0 = vcmask 261120   ;;  %vm451_vm1 = vcmask 130048   ;;  %v449_v15 = vlaneseq }
  0x1d   : > { %433 = vmatpush.msra.mxu0 %v406_v0  ;;  %v403_v3 = vld [vmem:[%s1286_s3] sm:$0xff]  ;;  %s412_s29 = ssub.f32 0.0, %s411_s11  ;;  %vm472_vm5 = vcmask 7168   ;;  %v1004_v53 = vmov 0.0  }
  0x1e   : > { %s1130_s22 = sshll.u32 %s391_s14, 3  ;;  %v450_v16 = vand.u32 127, %v449_v15  ;;  %s1168_s14 = sshll.u32 %s1087_s0, 3  ;;  %v523_v42 = vshrl.u32 %v449_v15, 7 }
  0x1f   : > { %434 = vmatpush.msra.mxu0 %v405_v1  ;;  %s393_s28 = scalar_lea.vmem %s1287_s2, %s1130_s22  ;;  %v413_v5 = vstv %s412_s29  ;;  %v867_v8 = vld [vmem:[%s1288_s5] ss:$0 sm:$0xff]  ;;  %s397_s16 = scalar_lea.vmem %s1271_s6, %s1130_s22  ;;  %v524_v45 = vstv %s1168_s14 }
  0x20   : > { %v1136_v4 = vld [vmem:[%s393_s28] sm:$0xff]  ;;  %v414_v6 = vmul.f32 1.442695, %v413_v5  ;;  %v408_v38 = vld [vmem:[%s1289_s4 + $0x8] sm:$0xff]  ;;  %v525_v46 = vadd.s32 %v524_v45, %v523_v42  ;;  %s1279_s28 = scalar_lea.vmem [#allocation4], %s1180_s27  ;;  %s612_s11 = scalar_lea.hbm %s1274_s9, %s1168_s14 }
  0x21   : > { %435 = vmatpush.msra.mxu0 %v404_v2  ;;  %v410_v18 = vld [vmem:[%s397_s16] sm:$0xff]  ;;  %504 = vmatpush.msra.mxu1 %v408_v38  ;;  %v527_v48 = vstv %s526_s13  ;;  %s401_s16 = scalar_lea.vmem %s1273_s8, %s1130_s22  ;;  %s382_s22 = scalar_lea.vmem [#allocation6], %s1180_s27 }
  0x22   : > { %868 = vpow2.f32 %v414_v6  ;;  %v407_v39 = vld [vmem:[%s1289_s4] sm:$0xff]  ;;  %vm528_vm4 = vcmp.lt.s32.totalorder %v525_v46, %v527_v48  ;;  %s616_s1 = sshll.u32 %s612_s11, 4  ;;  %s1201_s2 = scalar_lea.sflag [#allocation7], %s579_s15  ;;  %s617_s1 = int_to_ptr.hbm [resolvable:$true] %s616_s1 }
  0x23   : > { %436 = vmatpush.msra.mxu0 %v403_v3  ;;  %505 = vmatpush.msra.mxu1 %v407_v39  ;;  %v802_v54 = vsel %vm528_vm4, 1.0, %v1004_v53  ;;  %s894_s3 = sshra.s32 %s617_s1, 4  ;;  %s900_s0 = scalar_lea.hbm %s1274_s9, 24  ;;  %s895_s3 = int_to_ptr.hbm [resolvable:$true] %s894_s3 }
  0x24   : > { %799 = vmatmul.msk.f32.vlgmr.msra.gmra.mxu0 %vm417_vm0, %v1136_v4  ;;  %s896_s4 = scalar_lea.hbm %s895_s3, 8  ;;  %p901_p0 = scmp.lt.s32.totalorder %s895_s3, %s1274_s9 }
  0x25   : > { %p897_p11 = scmp.ne.s32.totalorder %s895_s3, %s896_s4  ;;  %p902_p1 = scmp.lt.s32.totalorder %s900_s0, %s896_s4 }
  0x27   : > { %p898_p12 = pnand %p897_p11, %p1106_p5  ;;  %p903_p2 = por %p902_p1, %p901_p0 }
  0x28   : > { %v869_v7 = vpop.eup %868 }
  0x29   : > { %811 = vpush %v869_v7  ;;  %p899_p13 = pneg %p898_p12 }
  0x2b   : > { %p904_p3 = pnand %p903_p2, %p899_p13 }
  0x5a   : > { %s1140_s30 = spop %811 }
  0x5b   : > { %s1277_s12 = smul.f32 0.5, %s1140_s30 }
  0x5d   : > { %v447_v11 = vstv %s1277_s12 }
  0xa1   : > { %v438_v9 = vpop.f32.mrf.mxu0 }
  0xa2   : > { %v442_v10 = vmul.f32 2.0, %v438_v9 }
  0xa4   : > { %v446_v12 = vsub.f32 %v867_v8, %v442_v10 }
  0xa6   : > { %v448_v13 = vmul.f32 %v447_v11, %v446_v12 }
  0xa8   : > { %v452_v14 = vsel %vm451_vm1, %v448_v13, inf }
  0xa9   : > { %453 = vmin.xlane.f32.xlu0 %v452_v14 }
 0x11c   : > { %v454_v17 = vpop.xlane.xlu0 %453 }
 0x11d   : > { %vm455_vm2 = vcmp.eq.f32.partialorder %v448_v13, %v454_v17  ;;  %v1153_v19 = vsub.f32 %v454_v17, %v448_v13 }
 0x11e   : > { %v456_v20 = vsel %vm455_vm2, %v450_v16, 16 }
 0x11f   : > { %v475_v21 = vadd.f32 %v1153_v19, %v410_v18  ;;  %v457_v23 = vsel %vm451_vm1, %v456_v20, 2147483647  ;;  %v511_v29 = vmul.f32 1.442695, %v1153_v19 }
 0x120   : > { %v459_v24 = vshra.s32 %v457_v23, 16  ;;  %v458_v35 = vand.u32 65535, %v457_v23 }
 0x121   : > { %v476_v22 = vsel %vm451_vm1, %v475_v21, -inf }
 0x122   : > { %477 = vmax.xlane.f32.xlu0 %v476_v22  ;;  %v461_v25 = vcvt.s32.f32 %v459_v24  ;;  %v460_v36 = vcvt.s32.f32 %v458_v35 }
 0x12a   : > { %462 = vmin.xlane.f32.xlu0 %v461_v25 }
 0x195   : > { %v478_v26 = vpop.xlane.xlu0 %477 }
 0x196   : > { %v479_v27 = vsub.f32 %v475_v21, %v478_v26 }
 0x198   : > { %v480_v28 = vmul.f32 1.442695, %v479_v27 }
 0x19a   : > { %870 = vpow2.f32 %v480_v28 }
 0x19b   : > { %872 = vpow2.f32 %v511_v29 }
 0x19d   : > { %v463_v34 = vpop.xlane.xlu0 %462 }
 0x19e   : > { %vm464_vm3 = vcmp.eq.f32.partialorder %v461_v25, %v463_v34  ;;  %v469_v47 = vcvt.f32.s32 %v463_v34 }
 0x19f   : > { %v465_v37 = vsel %vm464_vm3, %v460_v36, inf }
 0x1a0   : > { %v871_v30 = vpop.eup %870  ;;  %v470_v50 = vshll.u32 %v469_v47, 16 }
 0x1a1   : > { %v482_v31 = vsel %vm451_vm1, %v871_v30, 0.0  ;;  %v873_v32 = vpop.eup %872 }
 0x1a2   : > { %483 = vadd.xlane.f32.xlu1 %v482_v31  ;;  %v513_v33 = vsel %vm451_vm1, %v873_v32, 0.0 }
 0x1aa   : > { %514 = vadd.xlane.f32.xlu1 %v513_v33 }
 0x1b2   : > { %466 = vmin.xlane.f32.xlu1 %v465_v37 }
 0x215   : > { %v484_v40 = vpop.xlane.xlu1 %483 }
 0x216   : > { %874 = vrcp.f32 %v484_v40 }
 0x21c   : > { %v875_v41 = vpop.eup %874 }
 0x21d   : > { %v515_v43 = vpop.xlane.xlu1 %514  ;;  %v486_v44 = vmul.f32 %v875_v41, %v871_v30 }
 0x21e   : > { %876 = vlog2.f32 %v515_v43 }
 0x21f   : > { %800 = vmatmul.msk.f32.vlgmr.msra.gmra.mxu1 %vm451_vm1, %v486_v44  ;;  %878 = vrcp.f32 %v515_v43 }
 0x224   : > { %v877_v63 = vpop.eup %876 }
 0x225   : > { %v467_v49 = vpop.xlane.xlu1 %466  ;;  %v519_v0 = vmul.f32 0.6931472, %v877_v63  ;;  %v879_v3 = vpop.eup %878 }
 0x226   : > { %v468_v51 = vcvt.f32.s32 %v467_v49  ;;  %v517_v8 = vmul.f32 %v879_v3, %v873_v32 }
 0x227   : > { %v520_v5 = vsub.f32 %v1153_v19, %v519_v0 }
 0x228   : > { %v471_v52 = vadd.s32 %v470_v50, %v468_v51 }
 0x229   : > { %v545_v10 = vmul.f32 %v520_v5, %v517_v8 }
 0x22a   : > { %473 = vst.msk [vmem:[%s401_s16] sm:$0xff] %vm472_vm5, %v471_v52  ;;  %vm560_vm6 = vcmp.eq.s32.totalorder %v450_v16, %v471_v52  ;;  %s614_s16 = sshll.u32 %s382_s22, 4  ;;  %s615_s16 = int_to_ptr.vmem [resolvable:$true] %s614_s16 }
 0x22b   : > { %v561_v55 = vsel %vm560_vm6, %v802_v54, 0.0  ;;  %v546_v11 = vmul.f32 %v802_v54, %v545_v10 }
 0x22c   : > { %v562_v56 = vsel %vm451_vm1, %v561_v55, 0.0 }
 0x22d   : > { %v563_v57 = vrot.slane %v562_v56, 4  ;;  %v547_v12 = vsel %vm451_vm1, %v546_v11, 0.0 }
 0x22f   : > { %v564_v58 = vadd.f32 %v563_v57, %v562_v56 }
 0x231   : > { %v565_v59 = vrot.slane %v564_v58, 2 }
 0x233   : > { %v566_v60 = vadd.f32 %v565_v59, %v564_v58 }
 0x235   : > { %v567_v61 = vrot.slane %v566_v60, 1 }
 0x237   : > { %v568_v62 = vadd.f32 %v567_v61, %v566_v60 }
 0x239   : > { %569 = vst.msk [vmem:[%s382_s22] sm:$0xff] %vm451_vm1, %v568_v62 }
 0x29c   : > { %v507_v1 = vpop.f32.mrf.mxu1 }
 0x29d   : > { %510 = vst.msk [vmem:[%s1279_s28] sm:$0xff] %vm417_vm0, %v507_v1  ;;  %v531_v2 = vsub.f32 %v1136_v4, %v507_v1  ;;  %s595_s28 = scalar_lea.hbm %s1272_s7, %s1168_s14 }
 0x29f   : > { %v532_v6 = vmul.f32 %v531_v2, %v531_v2 }
 0x2a1   : > { %v533_v7 = vmul.f32 %v802_v54, %v532_v6 }
 0x2a3   : > { %v534_v9 = vsel %vm417_vm0, %v533_v7, 0.0 }
 0x2a4   : > { %535 = vadd.xlane.f32.xlu2 %v534_v9 }
 0x2ac   : > { %548 = vadd.xlane.f32.xlu2 %v547_v12 }
 0x2ad   : > { %907 = shalt.err (!%p904_p3)
}
 0x2ae   : > { %818 = dma.vmem_to_hbm [thread:$0]  (%p1106_p5), %s615_s16, 128, %s617_s1, %s1201_s2  }
 0x2af   : > { %s1290_s12 = scalar_lea.vmem [#allocation4], %s1180_s27  ;;  %s599_s15 = sshll.u32 %s595_s28, 4  ;;  %s600_s15 = int_to_ptr.hbm [resolvable:$true] %s599_s15 }
 0x2b0   : > { %s597_s23 = sshll.u32 %s1290_s12, 4  ;;  %s1291_s29 = sand.u32 1, %s994_s18   ;;  %s598_s23 = int_to_ptr.vmem [resolvable:$true] %s597_s23 }
 0x2b1   : > { %s571_s13 = scalar_lea.sflag [#allocation5], %s1291_s29  ;;  %s922_s22 = sshra.s32 %s600_s15, 4  ;;  %s923_s22 = int_to_ptr.hbm [resolvable:$true] %s922_s22 }
 0x2b2   : > { %s924_s3 = scalar_lea.hbm %s923_s22, 8  ;;  %s928_s11 = scalar_lea.hbm %s1272_s7, 24 }
 0x2b3   : > { %p925_p4 = scmp.ne.s32.totalorder %s923_s22, %s924_s3  ;;  %p929_p9 = scmp.lt.s32.totalorder %s923_s22, %s1272_s7 }
 0x2b4   : > { %p930_p10 = scmp.lt.s32.totalorder %s928_s11, %s924_s3 }
 0x2b5   : > { %p926_p7 = pnand %p925_p4, %p1106_p5 }
 0x2b6   : > { %p931_p11 = por %p930_p10, %p929_p9 }
 0x2b7   : > { %p927_p8 = pneg %p926_p7 }
 0x2b9   : > { %p932_p12 = pnand %p931_p11, %p927_p8 }
 0x2bb   : > { %935 = shalt.err (!%p932_p12)
}
 0x2bc   : > { %817 = dma.vmem_to_hbm [thread:$0]  (%p1106_p5), %s598_s23, 128, %s600_s15, %s571_s13  }
 0x2bd   : > { %s626_s12 = scalar_lea.hbm %s1275_s10, %s1168_s14  ;;  %s389_s23 = scalar_lea.vmem [#allocation8], %s1180_s27 }
 0x2be   : > { %s628_s15 = sshll.u32 %s389_s23, 4  ;;  %s1292_s29 = smul.f32 0.5, %s1140_s30  ;;  %s629_s15 = int_to_ptr.vmem [resolvable:$true] %s628_s15 }
 0x2bf   : > { %s630_s22 = sshll.u32 %s626_s12, 4  ;;  %s956_s27 = scalar_lea.hbm %s1275_s10, 24  ;;  %s631_s22 = int_to_ptr.hbm [resolvable:$true] %s630_s22 }
 0x2c0   : > { %s950_s0 = sshra.s32 %s631_s22, 4  ;;  %s951_s0 = int_to_ptr.hbm [resolvable:$true] %s950_s0 }
 0x2c1   : > { %s952_s11 = scalar_lea.hbm %s951_s0, 8  ;;  %p957_p2 = scmp.lt.s32.totalorder %s951_s0, %s1275_s10 }
 0x2c2   : > { %p953_p13 = scmp.ne.s32.totalorder %s951_s0, %s952_s11  ;;  %p958_p3 = scmp.lt.s32.totalorder %s956_s27, %s952_s11 }
 0x2c4   : > { %p954_p0 = pnand %p953_p13, %p1106_p5  ;;  %p959_p4 = por %p958_p3, %p957_p2 }
 0x2c6   : > { %p955_p1 = pneg %p954_p0 }
 0x2c8   : > { %p960_p7 = pnand %p959_p4, %p955_p1 }
 0x317   : > { %v536_v4 = vpop.xlane.xlu2 %535 }
 0x318   : > { %v537_v13 = vrot.slane %v536_v4, 4 }
 0x31a   : > { %v538_v14 = vadd.f32 %v537_v13, %v536_v4 }
 0x31c   : > { %v539_v15 = vrot.slane %v538_v14, 2 }
 0x31e   : > { %v540_v16 = vadd.f32 %v539_v15, %v538_v14 }
 0x31f   : > { %v549_v17 = vpop.xlane.xlu2 %548 }
 0x320   : > { %v550_v18 = vrot.slane %v549_v17, 4  ;;  %v541_v19 = vrot.slane %v540_v16, 1 }
 0x322   : > { %v551_v20 = vadd.f32 %v550_v18, %v549_v17  ;;  %v542_v21 = vadd.f32 %v541_v19, %v540_v16 }
 0x324   : > { %v552_v22 = vrot.slane %v551_v20, 2  ;;  %813 = vpush %v542_v21 }
 0x326   : > { %v553_v23 = vadd.f32 %v552_v22, %v551_v20 }
 0x328   : > { %v554_v24 = vrot.slane %v553_v23, 1 }
 0x32a   : > { %v555_v25 = vadd.f32 %v554_v24, %v553_v23 }
 0x32c   : > { %815 = vpush %v555_v25 }
 0x355   : > { %s814_s5 = spop %813 }
 0x356   : > { %s544_s13 = smul.f32 %s814_s5, %s1292_s29 }
 0x35d   : > { %s816_s3 = spop %815 }
 0x35e   : > { %s557_s4 = sadd.f32 %s816_s3, %s544_s13 }
 0x360   : > { %v558_v26 = vstv %s557_s4 }
 0x361   : > { %559 = vst [vmem:[%s389_s23] sm:$0xff] %v558_v26 }
 0x362   : > { %963 = shalt.err (!%p960_p7)
}
 0x363   : > { %819 = dma.vmem_to_hbm [thread:$0]  (%p1106_p5), %s629_s15, 128, %s631_s22, %s1201_s2  }
 0x364 PF: > { %p833_p8 = scmp.ge.s32.totalorder %s1002_s20, 2  ;;  %s642_s28 = sand.u32 1, %s990_s17  }
 0x365   : > { %s643_s16 = scalar_lea.sflag [#allocation5], %s642_s28 }
 0x366   : > { %p824_p9 = pnand %p833_p8, %p1110_p6 }
 0x368   : > { %p825_p10 = pneg %p824_p9 }
 0x36a   : > { %981 = dma.done.wait (%p825_p10), %s643_s16, 128  }
 0x36b   : > { %983 = vsyncadd (%p825_p10), %s643_s16, 4294967168  ;;  %s1293_s12 = sadd.s32 4294967294, %s1002_s20  }
 0x36c   : > { %s659_s23 = sand.u32 1, %s1293_s12  }
 0x36d   : > { %s660_s29 = scalar_lea.sflag [#allocation7], %s659_s23 }
 0x36e   : > { %985 = dma.done.wait (%p825_p10), %s660_s29, 256  }
 0x36f   : > { %987 = vsyncadd (%p825_p10), %s660_s29, 4294967040  ;;  %p26_p5 = scmp.ge.s32.totalorder %s1091_s21, 5   ;;  %s1294_s17 = smov %s994_s18 }
 0x370   : > { %s1295_s18 = smov %s998_s19  ;;  %s1296_s19 = smov %s1104_s24 }
 0x371   : > { %s1297_s20 = smov %s1091_s21  ;;  %28 = sbr.rel (!%p26_p5) target bundleno = 12 (0xc), region = 130 }
 0x376   :  { %676 = vsyncpa [#allocation5], 1 }
 0x377   :  { %678 = vsyncpa [#allocation5 + $0x1], 1 }
 0x378   :  { %679 = vsyncpa [#allocation7], 1 }
 0x379   :  { %681 = vsyncpa [#allocation7 + $0x1], 1 }

</bundles_post_ra>
